<compile_context>
chip_gen: v6e
topology: v6e:2x2x1
jax: 0.10.0
libtpu: 0.0.40
codegen_flags: <defaults>
</compile_context>

<pallas_src>
import jax
import jax.numpy as jnp
from jax.experimental import pallas as pl
from jax.experimental.pallas import tpu as pltpu


def _round_up(v, m):
    return ((v + m - 1) // m) * m


def spiral_kernel(w1_ref, b1_ref, w2_ref, b2_ref, wd_ref, bd_ref, x_ref, o_ref):
    """Fused (linear->relu)x2 -> logit-diff -> 2-class log_softmax on one batch tile.

    Parameter refs hold the *pre-combined* SimpLinear weights (the curve combination
    is hoisted to the wrapper), so the body is pure per-tile compute.
    """
    x = x_ref[...]                                            # (TB, 2) f32

    # --- Layer 1 (K=2): two broadcast FMAs on the VPU (skip a padded K=2 MXU matmul).
    h1 = x[:, 0:1] * w1_ref[0:1, :] + x[:, 1:2] * w1_ref[1:2, :] + b1_ref[...]
    h1 = jnp.maximum(h1, 0.0)                                 # (TB, H) f32

    # --- Layer 2 (HxH): bf16 MXU operands (weights arrive pre-cast), f32 accumulation.
    h2 = jnp.dot(h1.astype(jnp.bfloat16), w2_ref[...],
                 preferred_element_type=jnp.float32) + b2_ref[...]
    h2 = jnp.maximum(h2, 0.0)                                 # (TB, H) f32

    # --- Output layer + 2-class log_softmax via the logit difference:
    #       d = l1 - l0 = h2 @ (W3[:,1]-W3[:,0]) + (B3[1]-B3[0])
    #       log p0 = -softplus(d),  log p1 = -softplus(-d)
    #     H-length dot done as VPU broadcast-multiply + XLU lane reduce (MXU stays free).
    d = jnp.sum(h2 * wd_ref[...], axis=-1, keepdims=True) + bd_ref[0]   # (TB, 1) f32
    t = jnp.log(1.0 + jnp.exp(-jnp.abs(d)))                   # stable softplus tail
    log_p0 = -(jnp.maximum(d, 0.0) + t)                       # = -softplus(d)
    log_p1 = -(jnp.maximum(-d, 0.0) + t)                      # = -softplus(-d)

    col = jax.lax.broadcasted_iota(jnp.int32, o_ref.shape, 1)  # (TB, 2)
    o_ref[...] = jnp.where(col == 0, log_p0, log_p1).astype(o_ref.dtype)


def combine_params(coeffs_t, packed):
    """Hoisted SimpLinear combine: grid-invariant work done once per call in XLA."""
    w1s, b1s, w2s, b2s, w3s, b3s = packed
    c = coeffs_t.astype(jnp.float32)

    def comb(stack):
        return jnp.tensordot(c, stack.astype(jnp.float32), axes=1)

    w1 = comb(w1s)                                 # (2, H)  f32  (VPU layer)
    b1 = comb(b1s)                                 # (1, H)  f32
    w2 = comb(w2s).astype(jnp.bfloat16)            # (H, H)  bf16 (MXU operand)
    b2 = comb(b2s)                                 # (1, H)  f32
    w3 = comb(w3s)                                 # (H, 2)  f32
    b3 = comb(b3s)                                 # (1, 2)  f32
    w_diff = (w3[:, 1] - w3[:, 0]).reshape(1, -1)  # (1, H)  f32
    b_diff = (b3[0, 1] - b3[0, 0]).reshape(1)      # (1,)    f32 (SMEM scalar)
    return w1, b1, w2, b2, w_diff, b_diff


def spiral_forward(x, coeffs_t, packed, *, block_batch=2048, min_tiles=4):
    """Batch-tiled pallas_call with pre-combined effective parameters."""
    w1, b1, w2, b2, w_diff, b_diff = combine_params(coeffs_t, packed)
    batch, n_in = x.shape
    n_hidden = w2.shape[0]
    n_out = 2

    # Batch tile: as large as block_batch allows (amortize ~0.35 us/step), but capped so
    # that large batches still produce >= min_tiles grid steps (populates both v7x TCs
    # under the "parallel" batch axis and gives each core pipelining slack). Multiple of 8.
    full_tile = _round_up(batch, 8)
    tb_cap = max(8, _round_up(pl.cdiv(batch, min_tiles), 8))
    TB = min(block_batch, full_tile, tb_cap)
    num_tiles = pl.cdiv(batch, TB)
    bp = num_tiles * TB
    pad = bp - batch
    xp = jnp.pad(x, ((0, pad), (0, 0))) if pad else x

    def resident(shape):
        # Full-size block with a constant index_map -> DMA'd once, stays resident in
        # VMEM across grid steps. (After pre-combine + bf16 these are tiny.)
        return pl.BlockSpec(shape, lambda i: (0,) * len(shape))

    # Scoped-VMEM request: footprint estimate + headroom, clamped to 32..48 MiB
    # (never request all 64 MiB of a v7x TC).
    resident_bytes = (w1.size + b1.size + b2.size + w_diff.size) * 4 + w2.size * 2
    io_bytes = TB * n_in * 4 + TB * n_out * 4
    interm_bytes = TB * n_hidden * (4 * 2 + 2 * 2)     # h1/h2 f32 + bf16 copies (rough)
    est = 2 * (resident_bytes + io_bytes) + interm_bytes
    vmem_limit = int(min(max(2 * est, 32 * 1024 * 1024), 48 * 1024 * 1024))

    out = pl.pallas_call(
        spiral_kernel,
        out_shape=jax.ShapeDtypeStruct((bp, n_out), jnp.float32),
        grid=(num_tiles,),
        in_specs=[
            resident(w1.shape), resident(b1.shape),              # layer 1
            resident(w2.shape), resident(b2.shape),              # layer 2 (bf16 W2)
            resident(w_diff.shape),                              # output logit-diff vector
            pl.BlockSpec(memory_space=pltpu.MemorySpace.SMEM),   # b_diff scalar
            pl.BlockSpec((TB, n_in), lambda i: (i, 0)),          # x tile
        ],
        out_specs=pl.BlockSpec((TB, n_out), lambda i: (i, 0)),
        compiler_params=pltpu.CompilerParams(
            dimension_semantics=("parallel",),       # shard batch tiles across v7x's 2 TCs
            vmem_limit_bytes=vmem_limit,
        ),
    )(w1, b1, w2, b2, w_diff, b_diff, xp)

    return out[:batch] if pad else out


def pack_params(params):
    """Stack per-bend params, pre-transpose weights to (in, out); big stacks in bf16."""
    def stack_w(ws, dtype):   # list of (out, in) -> (nb, in, out)
        return jnp.stack([w.T for w in ws]).astype(dtype)

    def stack_b(bs):          # list of (out,) -> (nb, 1, out)
        return jnp.stack([b.reshape(1, -1) for b in bs]).astype(jnp.float32)

    return (stack_w(params["l1_w"], jnp.float32), stack_b(params["l1_b"]),
            stack_w(params["l2_w"], jnp.bfloat16), stack_b(params["l2_b"]),
            stack_w(params["out_w"], jnp.bfloat16), stack_b(params["out_b"]))


def init_params(key, n_hidden, num_bends=1):
    """Deterministic synthetic init matching SimpLinear parameter shapes (PyTorch layout)."""
    def linear_init(k, fan_in, fan_out):
        bound = 1.0 / jnp.sqrt(fan_in)
        kw, kb = jax.random.split(k)
        w = jax.random.uniform(kw, (fan_out, fan_in), jnp.float32, -bound, bound)
        b = jax.random.uniform(kb, (fan_out,), jnp.float32, -bound, bound)
        return w, b

    keys = jax.random.split(key, 3 * num_bends)
    params = {"l1_w": [], "l1_b": [], "l2_w": [], "l2_b": [], "out_w": [], "out_b": []}
    for i in range(num_bends):
        w, b = linear_init(keys[3 * i + 0], 2, n_hidden)
        params["l1_w"].append(w); params["l1_b"].append(b)
        w, b = linear_init(keys[3 * i + 1], n_hidden, n_hidden)
        params["l2_w"].append(w); params["l2_b"].append(b)
        w, b = linear_init(keys[3 * i + 2], n_hidden, 2)
        params["out_w"].append(w); params["out_b"].append(b)
    return params


def ref_forward(x, coeffs_t, packed, *, match_kernel_precision):
    """Pure-JAX reference. match_kernel_precision=True mirrors the bf16 layer-2 MXU."""
    w1s, b1s, w2s, b2s, w3s, b3s = packed
    c = coeffs_t.astype(jnp.float32).reshape(-1, 1, 1)
    W1 = jnp.sum(c * w1s.astype(jnp.float32), 0); B1 = jnp.sum(c * b1s.astype(jnp.float32), 0)
    W2 = jnp.sum(c * w2s.astype(jnp.float32), 0); B2 = jnp.sum(c * b2s.astype(jnp.float32), 0)
    W3 = jnp.sum(c * w3s.astype(jnp.float32), 0); B3 = jnp.sum(c * b3s.astype(jnp.float32), 0)

    h1 = jnp.maximum(x @ W1 + B1, 0.0)
    if match_kernel_precision:
        h2 = jnp.dot(h1.astype(jnp.bfloat16), W2.astype(jnp.bfloat16),
                     preferred_element_type=jnp.float32) + B2
    else:
        h2 = h1 @ W2 + B2
    h2 = jnp.maximum(h2, 0.0)
    logits = h2 @ W3 + B3
    return jax.nn.log_softmax(logits, axis=-1)


if __name__ == "__main__":
    key = jax.random.PRNGKey(0)
    k_x, k_p = jax.random.split(key)

    batch = 8
    n_hidden = 32          # small stand-in for the default 512
    num_bends = 1          # fix_points=[False]

    x = jax.random.normal(k_x, (batch, 2), jnp.float32)
    coeffs_t = jnp.ones((num_bends,), jnp.float32)
    params = init_params(k_p, n_hidden, num_bends)
    packed = pack_params(params)

    # Single-tile run.
    out = jax.block_until_ready(spiral_forward(x, coeffs_t, packed))
    assert out.shape == (batch, 2)
    # Each row of a 2-class log_softmax must satisfy logsumexp == 0.
    assert jnp.allclose(jax.scipy.special.logsumexp(out, axis=-1), 0.0, atol=1e-5)

    ref_mxu = ref_forward(x, coeffs_t, packed, match_kernel_precision=True)
    ref_f32 = ref_forward(x, coeffs_t, packed, match_kernel_precision=False)
    assert jnp.allclose(out, ref_mxu, atol=2e-3), "mismatch vs bf16-MXU reference"
    assert jnp.allclose(out, ref_f32, atol=5e-2), "mismatch vs f32 reference"

    # Multi-tile grid path (batch not a multiple of the tile; exercises padding,
    # the min_tiles cap, and resident-weight reuse across grid steps).
    batch2 = 200
    x2 = jax.random.normal(jax.random.PRNGKey(1), (batch2, 2), jnp.float32)
    out2 = jax.block_until_ready(
        spiral_forward(x2, coeffs_t, packed, block_batch=64))
    assert out2.shape == (batch2, 2)
    ref2 = ref_forward(x2, coeffs_t, packed, match_kernel_precision=True)
    assert jnp.allclose(out2, ref2, atol=2e-3), "mismatch vs reference (tiled path)"

    # num_bends > 1 exercises the (hoisted) SimpLinear curve combination.
    params3 = init_params(jax.random.PRNGKey(2), n_hidden, num_bends=2)
    packed3 = pack_params(params3)
    coeffs3 = jnp.array([0.25, 0.75], jnp.float32)
    x3 = jax.random.normal(jax.random.PRNGKey(3), (16, 2), jnp.float32)
    out3 = jax.block_until_ready(spiral_forward(x3, coeffs3, packed3))
    ref3 = ref_forward(x3, coeffs3, packed3, match_kernel_precision=True)
    assert jnp.allclose(out3, ref3, atol=2e-3), "mismatch vs reference (num_bends=2)"

    print("KERNEL_OK")
</pallas_src>

<mosaic_0001>
module attributes {stable_mosaic.version = 11 : i64} {
  func.func @spiral_kernel(%arg0: i32, %arg1: memref<2x32xf32, #tpu.memory_space<vmem>>, %arg2: memref<1x32xf32, #tpu.memory_space<vmem>>, %arg3: memref<32x32xbf16, #tpu.memory_space<vmem>>, %arg4: memref<1x32xf32, #tpu.memory_space<vmem>>, %arg5: memref<1x32xf32, #tpu.memory_space<vmem>>, %arg6: memref<1xf32, #tpu.memory_space<smem>>, %arg7: memref<8x2xf32, #tpu.memory_space<vmem>>, %arg8: memref<8x2xf32, #tpu.memory_space<vmem>>) attributes {dimension_semantics = [#tpu.dimension_semantics<parallel>], iteration_bounds = array<i64: 1>, scalar_prefetch = 0 : i64, scratch_operands = 0 : i64, tpu.core_type = #tpu.core_type<tc>, window_params = [{pipeline_mode = #tpu.pipeline_mode<synchronous>, transform_indices = @transform_0, window_bounds = array<i64: 2, 32>}, {pipeline_mode = #tpu.pipeline_mode<synchronous>, transform_indices = @transform_1, window_bounds = array<i64: 1, 32>}, {pipeline_mode = #tpu.pipeline_mode<synchronous>, transform_indices = @transform_2, window_bounds = array<i64: 32, 32>}, {pipeline_mode = #tpu.pipeline_mode<synchronous>, transform_indices = @transform_3, window_bounds = array<i64: 1, 32>}, {pipeline_mode = #tpu.pipeline_mode<synchronous>, transform_indices = @transform_4, window_bounds = array<i64: 1, 32>}, {transform_indices = @transform_5, window_bounds = array<i64: 1>}, {transform_indices = @transform_6, window_bounds = array<i64: 8, 2>}, {transform_indices = @transform_7, window_bounds = array<i64: 8, 2>}]} {
    %c0 = arith.constant 0 : index
    %c0_0 = arith.constant 0 : index
    %0 = vector.load %arg7[%c0, %c0_0] : memref<8x2xf32, #tpu.memory_space<vmem>>, vector<8x2xf32>
    %1 = vector.extract_strided_slice %0 {offsets = [0, 0], sizes = [8, 1], strides = [1, 1]} : vector<8x2xf32> to vector<8x1xf32>
    %c0_1 = arith.constant 0 : index
    %c0_2 = arith.constant 0 : index
    %2 = vector.load %arg1[%c0_1, %c0_2] : memref<2x32xf32, #tpu.memory_space<vmem>>, vector<1x32xf32>
    %3 = vector.broadcast %1 : vector<8x1xf32> to vector<8x32xf32>
    %4 = vector.broadcast %2 : vector<1x32xf32> to vector<8x32xf32>
    %5 = arith.mulf %3, %4 : vector<8x32xf32>
    %6 = vector.extract_strided_slice %0 {offsets = [0, 1], sizes = [8, 1], strides = [1, 1]} : vector<8x2xf32> to vector<8x1xf32>
    %c1 = arith.constant 1 : index
    %c0_3 = arith.constant 0 : index
    %7 = vector.load %arg1[%c1, %c0_3] : memref<2x32xf32, #tpu.memory_space<vmem>>, vector<1x32xf32>
    %8 = vector.broadcast %6 : vector<8x1xf32> to vector<8x32xf32>
    %9 = vector.broadcast %7 : vector<1x32xf32> to vector<8x32xf32>
    %10 = arith.mulf %8, %9 : vector<8x32xf32>
    %11 = arith.addf %5, %10 : vector<8x32xf32>
    %c0_4 = arith.constant 0 : index
    %c0_5 = arith.constant 0 : index
    %12 = vector.load %arg2[%c0_4, %c0_5] : memref<1x32xf32, #tpu.memory_space<vmem>>, vector<1x32xf32>
    %13 = vector.broadcast %12 : vector<1x32xf32> to vector<8x32xf32>
    %14 = arith.addf %11, %13 : vector<8x32xf32>
    %cst = arith.constant 0.000000e+00 : f32
    %15 = vector.broadcast %cst : f32 to vector<8x32xf32>
    %16 = arith.maximumf %14, %15 : vector<8x32xf32>
    %17 = arith.truncf %16 : vector<8x32xf32> to vector<8x32xbf16>
    %c0_6 = arith.constant 0 : index
    %c0_7 = arith.constant 0 : index
    %18 = vector.load %arg3[%c0_6, %c0_7] : memref<32x32xbf16, #tpu.memory_space<vmem>>, vector<32x32xbf16>
    %cst_8 = arith.constant dense<0.000000e+00> : vector<8x32xf32>
    %19 = tpu.matmul %17, %18, %cst_8 {dimension_numbers = #tpu.dot_dimension_numbers<[1], [0], [0], [1], [0, 0, 1, 1], [], []>} : vector<8x32xbf16>, vector<32x32xbf16>, vector<8x32xf32> -> vector<8x32xf32>
    %c0_9 = arith.constant 0 : index
    %c0_10 = arith.constant 0 : index
    %20 = vector.load %arg4[%c0_9, %c0_10] : memref<1x32xf32, #tpu.memory_space<vmem>>, vector<1x32xf32>
    %21 = vector.broadcast %20 : vector<1x32xf32> to vector<8x32xf32>
    %22 = arith.addf %19, %21 : vector<8x32xf32>
    %cst_11 = arith.constant 0.000000e+00 : f32
    %23 = vector.broadcast %cst_11 : f32 to vector<8x32xf32>
    %24 = arith.maximumf %22, %23 : vector<8x32xf32>
    %c0_12 = arith.constant 0 : index
    %c0_13 = arith.constant 0 : index
    %25 = vector.load %arg5[%c0_12, %c0_13] : memref<1x32xf32, #tpu.memory_space<vmem>>, vector<1x32xf32>
    %26 = vector.broadcast %25 : vector<1x32xf32> to vector<8x32xf32>
    %27 = arith.mulf %24, %26 : vector<8x32xf32>
    %cst_14 = arith.constant dense<0.000000e+00> : vector<8xf32>
    %28 = vector.multi_reduction <add>, %27, %cst_14 [1] : vector<8x32xf32> to vector<8xf32>
    %29 = vector.shape_cast %28 : vector<8xf32> to vector<8x1xf32>
    %c0_15 = arith.constant 0 : index
    %30 = memref.load %arg6[%c0_15] : memref<1xf32, #tpu.memory_space<smem>>
    %31 = vector.broadcast %30 : f32 to vector<8x1xf32>
    %32 = arith.addf %29, %31 : vector<8x1xf32>
    %33 = math.absf %32 : vector<8x1xf32>
    %cst_16 = arith.constant 0.000000e+00 : f32
    %34 = vector.broadcast %cst_16 : f32 to vector<8x1xf32>
    %35 = arith.subf %34, %33 : vector<8x1xf32>
    %36 = math.exp %35 : vector<8x1xf32>
    %cst_17 = arith.constant 1.000000e+00 : f32
    %37 = vector.broadcast %cst_17 : f32 to vector<8x1xf32>
    %38 = arith.addf %37, %36 : vector<8x1xf32>
    %39 = math.log %38 : vector<8x1xf32>
    %cst_18 = arith.constant 0.000000e+00 : f32
    %40 = vector.broadcast %cst_18 : f32 to vector<8x1xf32>
    %41 = arith.maximumf %32, %40 : vector<8x1xf32>
    %42 = arith.addf %41, %39 : vector<8x1xf32>
    %cst_19 = arith.constant 0.000000e+00 : f32
    %43 = vector.broadcast %cst_19 : f32 to vector<8x1xf32>
    %44 = arith.subf %43, %42 : vector<8x1xf32>
    %cst_20 = arith.constant 0.000000e+00 : f32
    %45 = vector.broadcast %cst_20 : f32 to vector<8x1xf32>
    %46 = arith.subf %45, %32 : vector<8x1xf32>
    %cst_21 = arith.constant 0.000000e+00 : f32
    %47 = vector.broadcast %cst_21 : f32 to vector<8x1xf32>
    %48 = arith.maximumf %46, %47 : vector<8x1xf32>
    %49 = arith.addf %48, %39 : vector<8x1xf32>
    %cst_22 = arith.constant 0.000000e+00 : f32
    %50 = vector.broadcast %cst_22 : f32 to vector<8x1xf32>
    %51 = arith.subf %50, %49 : vector<8x1xf32>
    %52 = tpu.iota {dimensions = array<i32: 1>} : vector<8x2xi32>
    %c0_i32 = arith.constant 0 : i32
    %53 = vector.broadcast %c0_i32 : i32 to vector<8x2xi32>
    %54 = arith.cmpi eq, %52, %53 : vector<8x2xi32>
    %55 = vector.shape_cast %44 : vector<8x1xf32> to vector<8x1xf32>
    %56 = vector.broadcast %55 : vector<8x1xf32> to vector<8x2xf32>
    %57 = vector.shape_cast %51 : vector<8x1xf32> to vector<8x1xf32>
    %58 = vector.broadcast %57 : vector<8x1xf32> to vector<8x2xf32>
    %59 = arith.select %54, %56, %58 : vector<8x2xi1>, vector<8x2xf32>
    %c0_23 = arith.constant 0 : index
    %c0_24 = arith.constant 0 : index
    %60 = vector.load %arg8[%c0_23, %c0_24] : memref<8x2xf32, #tpu.memory_space<vmem>>, vector<8x2xf32>
    tpu.vector_store %arg8[%c0_23, %c0_24], %59 {strides = array<i32>} : memref<8x2xf32, #tpu.memory_space<vmem>>, vector<8x2xf32>,
    return
  }
  func.func @transform_0(%arg0: i32) -> (i32, i32) {
    %c0_i32 = arith.constant 0 : i32
    %c0_i32_0 = arith.constant 0 : i32
    %c0_i32_1 = arith.constant 0 : i32
    return %c0_i32, %c0_i32_0 : i32, i32
  }
  func.func @transform_1(%arg0: i32) -> (i32, i32) {
    %c0_i32 = arith.constant 0 : i32
    %c0_i32_0 = arith.constant 0 : i32
    %c0_i32_1 = arith.constant 0 : i32
    return %c0_i32, %c0_i32_0 : i32, i32
  }
  func.func @transform_2(%arg0: i32) -> (i32, i32) {
    %c0_i32 = arith.constant 0 : i32
    %c0_i32_0 = arith.constant 0 : i32
    %c0_i32_1 = arith.constant 0 : i32
    return %c0_i32, %c0_i32_0 : i32, i32
  }
  func.func @transform_3(%arg0: i32) -> (i32, i32) {
    %c0_i32 = arith.constant 0 : i32
    %c0_i32_0 = arith.constant 0 : i32
    %c0_i32_1 = arith.constant 0 : i32
    return %c0_i32, %c0_i32_0 : i32, i32
  }
  func.func @transform_4(%arg0: i32) -> (i32, i32) {
    %c0_i32 = arith.constant 0 : i32
    %c0_i32_0 = arith.constant 0 : i32
    %c0_i32_1 = arith.constant 0 : i32
    return %c0_i32, %c0_i32_0 : i32, i32
  }
  func.func @transform_5(%arg0: i32) -> i32 {
    %c0_i32 = arith.constant 0 : i32
    %c0_i32_0 = arith.constant 0 : i32
    return %c0_i32 : i32
  }
  func.func @transform_6(%arg0: i32) -> (i32, i32) {
    %c0_i32 = arith.constant 0 : i32
    %c0_i32_0 = arith.constant 0 : i32
    return %arg0, %c0_i32 : i32, i32
  }
  func.func @transform_7(%arg0: i32) -> (i32, i32) {
    %c0_i32 = arith.constant 0 : i32
    %c0_i32_0 = arith.constant 0 : i32
    return %arg0, %c0_i32 : i32, i32
  }
}

</mosaic_0001>

<bundles_post_ra>
// kernel: tpu_custom_call.1
= control target key start
LH: loop header
LB: loop body
LE: loop exit
PB: predicated region body
PF: predicated region fallthrough
CT: control target
= control target key end

     0   :  { %13 = vsyncpa [#allocation4], 0  ;;  %s238_s24 = smov [#allocation3]   ;;  %s312_s0 = inlined_call_operand.vmem [shape: f32[2,32], index: 0, kind: input, shape index: {}]   ;;  %s313_s1 = inlined_call_operand.vmem [shape: f32[1,32], index: 1, kind: input, shape index: {}]   ;;  %s314_s2 = inlined_call_operand.hbm [shape: bf16[32,32], index: 2, kind: input, shape index: {}]   ;;  %s315_s3 = inlined_call_operand.vmem [shape: f32[1,32], index: 3, kind: input, shape index: {}]   ;;  %s316_s4 = inlined_call_operand.vmem [shape: f32[1,32], index: 4, kind: input, shape index: {}]   ;;  %s317_s5 = inlined_call_operand.<no memory space> [shape: f32[1], index: 5, kind: input, shape index: {}]   ;;  %s318_s6 = inlined_call_operand.vmem [shape: f32[8,2], index: 6, kind: input, shape index: {}]   ;;  %s319_s7 = inlined_call_operand.vmem [shape: f32[8,2], index: 7, kind: output, shape index: {}]  }
   0x1   :  { %s23_s25 = sshll.u32 %s238_s24, 4  ;;  %s24_s25 = int_to_ptr.vmem [resolvable:$true] %s23_s25 }
   0x2   :  { %s224_s26 = scalar_lea.vmem %s24_s25, 256  ;;  %p229_p1 = scmp.lt.s32.totalorder %s24_s25, %s24_s25 }
   0x3   :  { %p225_p0 = scmp.ne.s32.totalorder %s24_s25, %s224_s26  ;;  %p230_p2 = scmp.lt.s32.totalorder %s224_s26, %s224_s26 }
   0x5   :  { %p231_p3 = por %p230_p2, %p229_p1 }
   0x7   :  { %p232_p4 = pnand %p231_p3, %p225_p0 }
   0x9   :  { %235 = shalt.err (!%p232_p4)
}
   0xa   :  { %s239_s27 = smov 64   ;;  %s240_s28 = smov 4  }
   0xb   :  { %29 = dma.hbm_to_vmem [thread:$0]  %s314_s2, 256, %s24_s25, [#allocation4], %s239_s27, %s239_s27, %s240_s28  }
   0xc   :  { %236 = dma.done.wait [#allocation4], 256  }
   0xd   :  { %237 = vsyncadd [#allocation4], 4294967040  ;;  %v241_v0 = vmov 0   ;;  %v42_v1 = vld [vmem:[%s318_s6] sm:$0xff]  ;;  %v210_v2 = vld [vmem:[#allocation3 + $0x8] sm:$0xff]   ;;  %v242_v3 = vmov 0.0   ;;  %v155_v27 = vstv %s317_s5  ;;  %v171_v35 = vlaneseq }
   0xe   :  { %208 = vset.pattern.permute.xlu0 %v241_v0  ;;  %193 = vmatprep.subr.bf16.mxu0 %v242_v3  ;;  %v243_v4 = vmov 1   ;;  %v211_v5 = vld [vmem:[#allocation3] sm:$0xff]   ;;  %vm244_vm0 = vmmov 0   ;;  %vm98_vm1 = vcmask 261120   ;;  %vm175_vm3 = vcmask 15360  }
   0xf   :  { %46 = vperm.xlu0 %208, %v42_v1   ;;  %194 = vmatpush3.bf16.msra.mxu0 %v210_v2  ;;  %v182_v7 = vld [vmem:[%s312_s0] ss:$0 sm:$0xff]  ;;  %v183_v8 = vld [vmem:[%s312_s0 + $0x1] ss:$0 sm:$0xff]  ;;  %v172_v38 = vand.u32 127, %v171_v35 }
  0x10   :  { %195 = vmatprep.subr.bf16.mxu0 %v242_v3  ;;  %197 = vmatprep.mubr.msk.bf16.mxu0 %vm244_vm0, %v242_v3  ;;  %v184_v12 = vld [vmem:[%s313_s1] ss:$0 sm:$0xff] }
  0x11   :  { %v185_v17 = vld [vmem:[%s315_s3] ss:$0 sm:$0xff]  ;;  %vm173_vm2 = vcmp.eq.s32.totalorder %v172_v38, 0 }
  0x12   :  { %v189_v21 = vld [vmem:[%s316_s4] ss:$0 sm:$0xff] }
  0x13   :  { %209 = vset.pattern.permute.xlu0 %v243_v4  ;;  %196 = vmatpush3.bf16.msra.mxu0 %v211_v5 }
  0x14   :  { %56 = vperm.xlu0 %209, %v42_v1  }
  0x8a   :  { %v47_v6 = vpop.permute.xlu0 %46 }
  0x8b   :  { %v53_v10 = vmul.f32 %v182_v7, %v47_v6 }
  0x8f   :  { %v57_v9 = vpop.permute.xlu0 %56 }
  0x90   :  { %v63_v11 = vmul.f32 %v183_v8, %v57_v9 }
  0x92   :  { %v64_v13 = vadd.f32 %v63_v11, %v53_v10 }
  0x94   :  { %v72_v14 = vadd.f32 %v184_v12, %v64_v13 }
  0x96   :  { %v73_v15 = vmax.f32 %v72_v14, 0.0 }
  0x98   :  { %v74_v16 = vpack.c.bf16 %v73_v15, %v73_v15 }
  0x9a   :  { %198 = vmatmul.mubr.msk.bf16.vlgmr.msra.gmra.mxu0 %vm98_vm1, %v74_v16 }
 0x15a   :  { %v136_v18 = vpop.f32.mrf.mxu0 }
 0x15b   :  { %v137_v19 = vadd.f32 %v185_v17, %v136_v18 }
 0x15c   :  { %v199_v20 = vpop.f32.mrf.mxu0 }
 0x15d   :  { %v142_v22 = vmax.f32 %v137_v19, 0.0 }
 0x15e   :  { %v139_v23 = vpop.f32.mrf.mxu0 }
 0x15f   :  { %v150_v24 = vmul.f32 %v189_v21, %v142_v22 }
 0x160   :  { %v200_v25 = vpop.f32.mrf.mxu0 }
 0x161   :  { %v151_v26 = vsel %vm98_vm1, %v150_v24, 0.0 }
 0x162   :  { %152 = vadd.xlane.f32.xlu1 %v151_v26 }
 0x1eb   :  { %v153_v28 = vpop.xlane.xlu1 %152 }
 0x1ec   :  { %v156_v29 = vadd.f32 %v155_v27, %v153_v28 }
 0x1ee   :  { %v157_v30 = vand.u32 2147483647, %v156_v29  ;;  %v167_v36 = vsub.f32 0.0, %v156_v29  ;;  %v164_v40 = vmax.f32 %v156_v29, 0.0 }
 0x1f0   :  { %v158_v31 = vsub.f32 0.0, %v157_v30  ;;  %v168_v41 = vmax.f32 %v167_v36, 0.0 }
 0x1f2   :  { %v159_v32 = vmul.f32 1.442695, %v158_v31 }
 0x1f4   :  { %212 = vpow2.f32 %v159_v32 }
 0x201   :  { %v213_v33 = vpop.eup %212 }
 0x202   :  { %v161_v34 = vadd.f32 1.0, %v213_v33 }
 0x204   :  { %214 = vlog2.f32 %v161_v34 }
 0x211   :  { %v215_v37 = vpop.eup %214 }
 0x212   :  { %v163_v39 = vmul.f32 0.6931472, %v215_v37 }
 0x214   :  { %v165_v42 = vadd.f32 %v164_v40, %v163_v39  ;;  %v169_v43 = vadd.f32 %v168_v41, %v163_v39 }
 0x216   :  { %v166_v44 = vsub.f32 0.0, %v165_v42  ;;  %v170_v45 = vsub.f32 0.0, %v169_v43 }
 0x218   :  { %v174_v46 = vsel %vm173_vm2, %v166_v44, %v170_v45 }
 0x219   :  { %176 = vst.msk [vmem:[%s319_s7] sm:$0xff] %vm175_vm3, %v174_v46 }
 0x21a   :  { %181 = vsyncpa [#allocation4], 1 }

</bundles_post_ra>
